<compile_context>
chip_gen: v7x
topology: tpu7x:2x2x1
jax: 0.10.0
libtpu: 0.0.40
codegen_flags: <defaults>
</compile_context>

<pallas_src>
import jax
import jax.numpy as jnp
from jax.experimental import pallas as pl
from jax.experimental.pallas import tpu as pltpu


def _round_up(x, m):
    return ((x + m - 1) // m) * m


def _make_l1_depth_kernel(s_total, s_tile, acc_width):
    """Builds the kernel body, closing over static tiling parameters."""
    needs_col_mask = (s_total % s_tile) != 0
    n_chunks = s_tile // acc_width  # acc_width divides s_tile by construction

    def _accumulate(acc_ref, diff):
        # Lane-dense VPU accumulation: one register-resident partial sum,
        # unrolled over 128-lane chunks, single scratch store per step.
        partial = acc_ref[...]
        for k in range(n_chunks):
            partial = partial + diff[:, k * acc_width:(k + 1) * acc_width]
        acc_ref[...] = partial

    def kernel(pred_ref, label_ref, out_ref, acc_ref):
        j = pl.program_id(1)              # S (reduction) axis
        last = pl.num_programs(1) - 1

        @pl.when(j == 0)
        def _init():
            acc_ref[...] = jnp.zeros_like(acc_ref)

        pred = pred_ref[...].astype(jnp.float32)    # (b_tile, s_tile)
        label = label_ref[...].astype(jnp.float32)  # (b_tile, s_tile)

        # Fused mask: ignore label == -1 (one cmp + select).
        base_valid = label != -1.0

        if needs_col_mask:
            # Only the final, partial S tile needs index masking (its block
            # padding is garbage, not -1).  Gate the iota/compare so all
            # full tiles stay mask-free VPU work.
            @pl.when(j < last)
            def _full_tile():
                diff = jnp.where(base_valid, jnp.abs(pred - label), 0.0)
                _accumulate(acc_ref, diff)

            @pl.when(j == last)
            def _partial_tile():
                col = jax.lax.broadcasted_iota(jnp.int32, pred.shape, 1)
                valid = jnp.logical_and(base_valid,
                                        (j * s_tile + col) < s_total)
                diff = jnp.where(valid, jnp.abs(pred - label), 0.0)
                _accumulate(acc_ref, diff)
        else:
            diff = jnp.where(base_valid, jnp.abs(pred - label), 0.0)
            _accumulate(acc_ref, diff)

        @pl.when(j == last)
        def _finalize():
            # Single cross-lane (XLU) reduce per B block, deferred to the
            # end of the S sweep.  Raw masked row sums; normalization is
            # done exactly in the JAX epilogue.
            # Note: rows of a partial last B block hold garbage, but Pallas
            # only writes back the in-bounds portion of out_ref, and the
            # epilogue reads exactly the first B rows.
            out_ref[...] = jnp.sum(acc_ref[...], axis=1, keepdims=True)

    return kernel


def l1_depth_loss(predictions, label_batch, length_batch, *, b_tile_max=256):
    """Pallas implementation of L1DepthLoss.forward.

    Args:
      predictions:  (B, S) predicted depths (any float dtype).
      label_batch:  (B, S) true depths (-1 marks padding), same shape.
      length_batch: (B,)   integer sentence lengths.

    Returns:
      (batch_loss, total_sents) float32 scalars.
    """
    B, S = predictions.shape

    # Per-dtype S tiling: bf16 blocks are half the bytes, so double the tile
    # to keep each per-step input block >= ~2 MiB (per-step overhead ~0.35us
    # stays negligible).  Worst-case double-buffered footprint:
    #   f32 : 2 inputs x 2 buffers x 256 x 2048 x 4B = 8 MiB
    #   bf16: 2 inputs x 2 buffers x 256 x 4096 x 2B = 8 MiB
    # both comfortably inside v7x's 32 MiB scoped / 64 MiB physical VMEM.
    itemsize = jnp.dtype(predictions.dtype).itemsize
    s_tile_max = 4096 if itemsize <= 2 else 2048

    # B tiling: when B > 8, force nb >= 2 so the "parallel" B axis can shard
    # across v7x's two TensorCores (no effect on single-TC v5e/v6e).
    if B <= 8:
        b_tile = B
    else:
        b_tile = min(b_tile_max, _round_up(pl.cdiv(B, 2), 8))
    s_tile = S if S <= s_tile_max else s_tile_max

    nb = pl.cdiv(B, b_tile)
    ns = pl.cdiv(S, s_tile)

    # Lane-dense accumulator width: 128 lanes when the tile allows it,
    # otherwise the (small) full tile width.
    acc_width = 128 if (s_tile % 128 == 0) else s_tile

    kernel = _make_l1_depth_kernel(S, s_tile, acc_width)

    per_sent = pl.pallas_call(
        kernel,
        out_shape=jax.ShapeDtypeStruct((B, 1), jnp.float32),
        grid_spec=pltpu.PrefetchScalarGridSpec(
            num_scalar_prefetch=0,
            grid=(nb, ns),
            in_specs=[
                pl.BlockSpec((b_tile, s_tile), lambda i, j: (i, j)),
                pl.BlockSpec((b_tile, s_tile), lambda i, j: (i, j)),
            ],
            out_specs=pl.BlockSpec((b_tile, 1), lambda i, j: (i, 0)),
            scratch_shapes=[pltpu.VMEM((b_tile, acc_width), jnp.float32)],
        ),
        compiler_params=pltpu.CompilerParams(
            dimension_semantics=("parallel", "arbitrary"),
            vmem_limit_bytes=48 * 1024 * 1024,
        ),
    )(predictions, label_batch)

    # O(B) epilogue (kept outside the kernel so the B axis stays "parallel").
    lengths_f = length_batch.astype(jnp.float32)
    total_sents = jnp.sum(length_batch != 0).astype(jnp.float32)
    # Exact per-sentence normalization; zero-length rows are guarded so a
    # 0/0 NaN cannot poison the batch sum (they are excluded by total_sents).
    norm = jnp.where(lengths_f > 0.0, per_sent[:, 0] / lengths_f, 0.0)
    batch_loss = jnp.where(total_sents > 0.0, jnp.sum(norm) / total_sents,
                           jnp.float32(0.0))
    return batch_loss, total_sents


def _reference(predictions, label_batch, length_batch):
    """Plain-JAX reference mirroring the PyTorch module."""
    total_sents = jnp.sum((length_batch != 0).astype(jnp.float32))
    labels_1s = (label_batch != -1.0).astype(jnp.float32)
    pm = predictions.astype(jnp.float32) * labels_1s
    lm = label_batch.astype(jnp.float32) * labels_1s
    loss_per_sent = jnp.sum(jnp.abs(pm - lm), axis=1)
    norm = loss_per_sent / length_batch.astype(jnp.float32)
    batch_loss = jnp.where(total_sents > 0, jnp.sum(norm) / total_sents, 0.0)
    return batch_loss, total_sents


if __name__ == "__main__":
    key = jax.random.PRNGKey(0)
    B, S = 4, 16

    kp, kl = jax.random.split(key)
    predictions = jax.random.normal(kp, (B, S), dtype=jnp.float32) * 3.0
    true_depths = jnp.abs(jax.random.normal(kl, (B, S), dtype=jnp.float32)) * 4.0

    # Sentence lengths (all nonzero) and -1 padding past each length.
    lengths = jnp.array([16, 10, 5, 8], dtype=jnp.int32)
    pos = jnp.arange(S)[None, :]
    valid = pos < lengths[:, None]
    label_batch = jnp.where(valid, true_depths, -1.0).astype(jnp.float32)

    batch_loss, total_sents = l1_depth_loss(predictions, label_batch, lengths)
    jax.block_until_ready((batch_loss, total_sents))

    ref_loss, ref_sents = _reference(predictions, label_batch, lengths)
    # Exact divide in the epilogue -> tight tolerances (only summation-order
    # float differences remain).
    assert jnp.allclose(batch_loss, ref_loss, rtol=1e-5, atol=1e-5), (
        batch_loss, ref_loss)
    assert jnp.allclose(total_sents, ref_sents), (total_sents, ref_sents)

    print("KERNEL_OK")
</pallas_src>

<mosaic_0001>
module attributes {stable_mosaic.version = 11 : i64} {
  func.func @kernel(%arg0: i32, %arg1: i32, %arg2: memref<4x16xf32, #tpu.memory_space<vmem>>, %arg3: memref<4x16xf32, #tpu.memory_space<vmem>>, %arg4: memref<4x1xf32, #tpu.memory_space<vmem>>, %arg5: memref<4x16xf32, #tpu.memory_space<vmem>>) attributes {dimension_semantics = [#tpu.dimension_semantics<parallel>, #tpu.dimension_semantics<arbitrary>], iteration_bounds = array<i64: 1, 1>, scalar_prefetch = 0 : i64, scratch_operands = 1 : i64, tpu.core_type = #tpu.core_type<tc>, window_params = [{transform_indices = @transform_0, window_bounds = array<i64: 4, 16>}, {transform_indices = @transform_1, window_bounds = array<i64: 4, 16>}, {transform_indices = @transform_2, window_bounds = array<i64: 4, 1>}]} {
    %c0_i32 = arith.constant 0 : i32
    %0 = arith.cmpi eq, %arg1, %c0_i32 : i32
    %1 = arith.extui %0 : i1 to i32
    %c0_i32_0 = arith.constant 0 : i32
    %2 = arith.cmpi ne, %1, %c0_i32_0 : i32
    scf.if %2 {
      %cst_11 = arith.constant 0.000000e+00 : f32
      %17 = vector.broadcast %cst_11 : f32 to vector<4x16xf32>
      %c0_12 = arith.constant 0 : index
      %c0_13 = arith.constant 0 : index
      %18 = vector.load %arg5[%c0_12, %c0_13] : memref<4x16xf32, #tpu.memory_space<vmem>>, vector<4x16xf32>
      tpu.vector_store %arg5[%c0_12, %c0_13], %17 {strides = array<i32>} : memref<4x16xf32, #tpu.memory_space<vmem>>, vector<4x16xf32>,
    } else {
    }
    %c0 = arith.constant 0 : index
    %c0_1 = arith.constant 0 : index
    %3 = vector.load %arg2[%c0, %c0_1] : memref<4x16xf32, #tpu.memory_space<vmem>>, vector<4x16xf32>
    %c0_2 = arith.constant 0 : index
    %c0_3 = arith.constant 0 : index
    %4 = vector.load %arg3[%c0_2, %c0_3] : memref<4x16xf32, #tpu.memory_space<vmem>>, vector<4x16xf32>
    %cst = arith.constant -1.000000e+00 : f32
    %5 = vector.broadcast %cst : f32 to vector<4x16xf32>
    %6 = arith.cmpf one, %4, %5 : vector<4x16xf32>
    %7 = arith.subf %3, %4 : vector<4x16xf32>
    %8 = math.absf %7 : vector<4x16xf32>
    %cst_4 = arith.constant 0.000000e+00 : f32
    %9 = vector.broadcast %cst_4 : f32 to vector<4x16xf32>
    %10 = arith.select %6, %8, %9 : vector<4x16xi1>, vector<4x16xf32>
    %c0_5 = arith.constant 0 : index
    %c0_6 = arith.constant 0 : index
    %11 = vector.load %arg5[%c0_5, %c0_6] : memref<4x16xf32, #tpu.memory_space<vmem>>, vector<4x16xf32>
    %12 = arith.addf %11, %10 : vector<4x16xf32>
    %c0_7 = arith.constant 0 : index
    %c0_8 = arith.constant 0 : index
    %13 = vector.load %arg5[%c0_7, %c0_8] : memref<4x16xf32, #tpu.memory_space<vmem>>, vector<4x16xf32>
    tpu.vector_store %arg5[%c0_7, %c0_8], %12 {strides = array<i32>} : memref<4x16xf32, #tpu.memory_space<vmem>>, vector<4x16xf32>,
    %c0_i32_9 = arith.constant 0 : i32
    %14 = arith.cmpi eq, %arg1, %c0_i32_9 : i32
    %15 = arith.extui %14 : i1 to i32
    %c0_i32_10 = arith.constant 0 : i32
    %16 = arith.cmpi ne, %15, %c0_i32_10 : i32
    scf.if %16 {
      %c0_11 = arith.constant 0 : index
      %c0_12 = arith.constant 0 : index
      %17 = vector.load %arg5[%c0_11, %c0_12] : memref<4x16xf32, #tpu.memory_space<vmem>>, vector<4x16xf32>
      %cst_13 = arith.constant dense<0.000000e+00> : vector<4xf32>
      %18 = vector.multi_reduction <add>, %17, %cst_13 [1] : vector<4x16xf32> to vector<4xf32>
      %19 = vector.shape_cast %18 : vector<4xf32> to vector<4x1xf32>
      %c0_14 = arith.constant 0 : index
      %c0_15 = arith.constant 0 : index
      %20 = vector.load %arg4[%c0_14, %c0_15] : memref<4x1xf32, #tpu.memory_space<vmem>>, vector<4x1xf32>
      tpu.vector_store %arg4[%c0_14, %c0_15], %19 {strides = array<i32>} : memref<4x1xf32, #tpu.memory_space<vmem>>, vector<4x1xf32>,
    } else {
    }
    return
  }
  func.func @transform_0(%arg0: i32, %arg1: i32) -> (i32, i32) {
    %c0_i32 = arith.constant 0 : i32
    return %arg0, %arg1 : i32, i32
  }
  func.func @transform_1(%arg0: i32, %arg1: i32) -> (i32, i32) {
    %c0_i32 = arith.constant 0 : i32
    return %arg0, %arg1 : i32, i32
  }
  func.func @transform_2(%arg0: i32, %arg1: i32) -> (i32, i32) {
    %c0_i32 = arith.constant 0 : i32
    %c0_i32_0 = arith.constant 0 : i32
    return %arg0, %c0_i32 : i32, i32
  }
}

</mosaic_0001>

<bundles_post_ra>
// kernel: tpu_custom_call.1
= control target key start
LH: loop header
LB: loop body
LE: loop exit
PB: predicated region body
PF: predicated region fallthrough
CT: control target
= control target key end

     0   :  { %7 = vsyncpa [#allocation4], 0  ;;  %s162_s0 = inlined_call_operand.hbm [shape: f32[4,16], index: 0, kind: input, shape index: {}]   ;;  %s163_s1 = inlined_call_operand.hbm [shape: f32[4,16], index: 1, kind: input, shape index: {}]   ;;  %s164_s2 = inlined_call_operand.vmem [shape: f32[4,1], index: 2, kind: output, shape index: {}]  }
   0x1   :  { %8 = vsyncpa [#allocation6], 0  ;;  %s117_s9 = smov [#allocation3]   ;;  %s118_s11 = smov [#allocation5]  }
   0x2   :  { %s15_s10 = sshll.u32 %s117_s9, 4  ;;  %s25_s12 = sshll.u32 %s118_s11, 4  ;;  %s16_s10 = int_to_ptr.vmem [resolvable:$true] %s15_s10  ;;  %s26_s12 = int_to_ptr.vmem [resolvable:$true] %s25_s12 }
   0x3   :  { %s69_s15 = scalar_lea.hbm %s162_s0, 64 }
   0x4   :  { %p70_p0 = scmp.ne.s32.totalorder %s162_s0, %s69_s15  ;;  %p73_p1 = scmp.lt.u32.totalorder %s69_s15, %s162_s0 }
   0x6   :  { %p75_p2 = pnand %p73_p1, %p70_p0 }
   0x8   :  { %78 = shalt.err (!%p75_p2)
}
   0x9   :  { %s79_s20 = scalar_lea.vmem %s16_s10, 64  ;;  %p84_p4 = scmp.lt.s32.totalorder %s16_s10, %s16_s10 }
   0xa   :  { %p80_p3 = scmp.ne.s32.totalorder %s16_s10, %s79_s20  ;;  %p85_p5 = scmp.lt.s32.totalorder %s79_s20, %s79_s20 }
   0xc   :  { %p86_p6 = por %p85_p5, %p84_p4 }
   0xe   :  { %p87_p7 = pnand %p86_p6, %p80_p3 }
  0x10   :  { %90 = shalt.err (!%p87_p7)
}
  0x11   :  { %18 = dma.hbm_to_vmem [thread:$0]  %s162_s0, 64, %s16_s10, [#allocation4]  }
  0x12   :  { %s91_s25 = scalar_lea.hbm %s163_s1, 64 }
  0x13   :  { %p92_p8 = scmp.ne.s32.totalorder %s163_s1, %s91_s25  ;;  %p95_p9 = scmp.lt.u32.totalorder %s91_s25, %s163_s1 }
  0x15   :  { %p97_p10 = pnand %p95_p9, %p92_p8 }
  0x17   :  { %100 = shalt.err (!%p97_p10)
}
  0x18   :  { %s101_s30 = scalar_lea.vmem %s26_s12, 64  ;;  %p106_p12 = scmp.lt.s32.totalorder %s26_s12, %s26_s12 }
  0x19   :  { %p102_p11 = scmp.ne.s32.totalorder %s26_s12, %s101_s30  ;;  %p107_p13 = scmp.lt.s32.totalorder %s101_s30, %s101_s30 }
  0x1b   :  { %p108_p0 = por %p107_p13, %p106_p12 }
  0x1d   :  { %p109_p1 = pnand %p108_p0, %p102_p11 }
  0x1f   :  { %112 = shalt.err (!%p109_p1)
}
  0x20   :  { %28 = dma.hbm_to_vmem [thread:$0]  %s163_s1, 64, %s26_s12, [#allocation6]  }
  0x21   :  { %113 = dma.done.wait [#allocation4], 64  }
  0x22   :  { %114 = vsyncadd [#allocation4], 4294967232 }
  0x23   :  { %115 = dma.done.wait [#allocation6], 64  }
  0x24   :  { %116 = vsyncadd [#allocation6], 4294967232  ;;  %vm39_vm0 = vcmask 125952   ;;  %v119_v0 = vmov 0.0   ;;  %v41_v1 = vld [vmem:[#allocation3] sm:$0xf] }
  0x25   :  { %40 = vst.msk [vmem:[#allocation2] sm:$0xf] %vm39_vm0, %v119_v0  ;;  %v42_v2 = vld [vmem:[#allocation5] sm:$0xf]  ;;  %vm58_vm2 = vcmask 3072  }
  0x26   :  { %v44_v3 = vsub.f32 %v41_v1, %v42_v2  ;;  %vm43_vm1 = vcmp.ne.f32.partialorder %v42_v2, -1.0 }
  0x28   :  { %v45_v4 = vand.u32 2147483647, %v44_v3 }
  0x2a   :  { %v46_v6 = vsel %vm43_vm1, %v45_v4, 0.0 }
  0x2c   :  { %v47_v5 = vld [vmem:[#allocation2] sm:$0xf] }
  0x2d   :  { %v48_v7 = vadd.f32 %v47_v5, %v46_v6 }
  0x2f   :  { %50 = vst.msk [vmem:[#allocation2] sm:$0xf] %vm39_vm0, %v48_v7 }
  0x36   :  { %v54_v8 = vld [vmem:[#allocation2] sm:$0xf] }
  0x37   :  { %v55_v9 = vsel %vm39_vm0, %v54_v8, 0.0 }
  0x38   :  { %56 = vadd.xlane.f32.xlu0 %v55_v9 }
  0xc5   :  { %v57_v10 = vpop.xlane.xlu0 %56 }
  0xc6   :  { %59 = vst.msk [vmem:[%s164_s2] sm:$0xf] %vm58_vm2, %v57_v10 }
  0xc7   :  { %64 = vsyncpa [#allocation4], 1 }
  0xc8   :  { %65 = vsyncpa [#allocation6], 1 }

</bundles_post_ra>
